<compile_context>
chip_gen: v5e
topology: v5e:2x2
jax: 0.10.0
libtpu: 0.0.40
codegen_flags: <defaults>
</compile_context>

<pallas_src>
import functools

import jax
import jax.numpy as jnp
import numpy as np
from jax.experimental import pallas as pl
from jax.experimental.pallas import tpu as pltpu

# ----------------------------- model config ---------------------------------
HIDDEN = 32          # config.hidden_size
EMB_DIM = 64         # embedding_model_to_dimension_and_pooling[...] dimension
LN_EPS = 1e-12       # config.layer_norm_eps
N_SIGN = 2
N_EXP = 16           # exponent vocab
N_FRAC = 8           # fraction-bin vocab
N_YEAR = 16
N_MONTH = 13
N_DAY = 32
N_WEEKDAY = 7
N_HOLIDAY = 4        # multi-hot holiday vector length

DEFAULT_TILE_N = 1024   # token-axis tile (multiple of 16: covers f32 & bf16 packing)


def _round_up(x, m):
    return (x + m - 1) // m * m


# ------------------------------ Pallas kernel --------------------------------
def _fused_kernel(x_ref, w_ref, bc_ref, bt_ref, gated_ref, istext_ref,
                  gamma_ref, beta_ref, out_ref, *, eps, emb_dim):
    """One token tile: gated K=2E projection + residual add + LayerNorm."""
    is_text = istext_ref[...]                       # [T, 1] f32 in {0, 1}
    x = x_ref[...]                                  # [T, 2E] = [col_e | con_e]

    # Gate the content half (lanes >= emb_dim) by is_text *before* the matmul:
    #     (is_text * con) @ Wt == is_text * (con @ Wt)
    # so a single K=2E contraction yields col@Wc + is_text*(con@Wt).
    lane = jax.lax.broadcasted_iota(jnp.int32, x.shape, dimension=1)
    gate = jnp.where(lane >= emb_dim, is_text, 1.0).astype(x.dtype)   # exact {0,1}
    proj = jnp.dot(x * gate, w_ref[...], preferred_element_type=jnp.float32)
    proj = proj + bc_ref[...] + bt_ref[...] * is_text                 # gated content bias

    # + (is_number * number_embeds + is_date * date_embeds), precomputed upstream
    y = proj + gated_ref[...].astype(jnp.float32)

    # LayerNorm over the hidden axis
    mean = jnp.mean(y, axis=-1, keepdims=True)
    cy = y - mean
    var = jnp.mean(cy * cy, axis=-1, keepdims=True)
    z = cy * jax.lax.rsqrt(var + eps)
    out_ref[...] = (z * gamma_ref[...] + beta_ref[...]).astype(out_ref.dtype)


def one_token_embeddings_fused(packed, w_packed, bc, bt, gated, is_text,
                               gamma, beta, *, eps=LN_EPS,
                               tile_n=DEFAULT_TILE_N, out_dtype=jnp.float32):
    """packed: [N, 2E]; gated: [N, H]; is_text: [N, 1] f32; -> [N, H]."""
    n, two_e = packed.shape
    h = w_packed.shape[1]
    emb_dim = two_e // 2

    # Token tile: multiple of 16 (sublane packing for f32 and bf16), no larger
    # than the padded token count.
    tile_n = max(16, min(tile_n, _round_up(n, 16)))
    n_pad = _round_up(n, tile_n)
    pad = n_pad - n
    if pad:
        packed = jnp.pad(packed, ((0, pad), (0, 0)))
        gated = jnp.pad(gated, ((0, pad), (0, 0)))
        is_text = jnp.pad(is_text, ((0, pad), (0, 0)))

    grid = (n_pad // tile_n,)

    def tiled(shape_tail):
        return pl.BlockSpec((tile_n,) + shape_tail, lambda i: (i, 0))

    def resident(shape):
        return pl.BlockSpec(shape, lambda i: (0, 0))

    in_item = jnp.dtype(packed.dtype).itemsize
    out_item = jnp.dtype(out_dtype).itemsize
    # double-buffered per-tile traffic + resident weights + headroom
    tile_in_bytes = tile_n * (two_e * in_item + h * 4 + 4)
    tile_out_bytes = tile_n * h * out_item
    vmem_limit = int(max(2 * (tile_in_bytes + tile_out_bytes)
                         + (two_e + 4) * h * 4 + (4 << 20),
                         16 << 20))

    cost = pl.CostEstimate(
        flops=2 * n_pad * two_e * h + 10 * n_pad * h,
        transcendentals=n_pad,                                # one rsqrt per token
        bytes_accessed=int(packed.nbytes + gated.nbytes + is_text.nbytes
                           + w_packed.nbytes + 4 * 4 * h
                           + n_pad * h * out_item))

    out = pl.pallas_call(
        functools.partial(_fused_kernel, eps=eps, emb_dim=emb_dim),
        out_shape=jax.ShapeDtypeStruct((n_pad, h), out_dtype),
        grid=grid,
        in_specs=[tiled((two_e,)),           # packed [col_e | con_e]
                  resident((two_e, h)),      # stacked [Wc; Wt]
                  resident((1, h)),          # column bias
                  resident((1, h)),          # content bias (gated in-kernel)
                  tiled((h,)),               # num/date pre-gated sum
                  tiled((1,)),               # is_text mask
                  resident((1, h)),          # LN gamma
                  resident((1, h))],         # LN beta
        out_specs=tiled((h,)),
        compiler_params=pltpu.CompilerParams(
            dimension_semantics=("parallel",),   # v7x megacore shards tokens
            vmem_limit_bytes=vmem_limit),
        cost_estimate=cost,
        # NOTE: if profiling still shows exposed DMA at small tiles, add
        # pipeline_mode=pl.Buffered(3) to the packed/gated in_specs.
    )(packed, w_packed, bc.reshape(1, h), bt.reshape(1, h),
      gated, is_text, gamma.reshape(1, h), beta.reshape(1, h))
    return out[:n]


# ------------------------ sub-module glue (plain JAX) ------------------------
def number_embeddings(p, is_positive, exponent, fraction_bin, delta,
                      percentile_values=None):
    # sum of three embedding lookups + a linear on the scalar `delta`
    e = p['sign'][is_positive] + p['exp'][exponent] + p['frac'][fraction_bin]
    e = e + delta[..., None] * p['delta_w'][None, None, :] + p['delta_b']
    # TODO(synk): percentile_values branch (use_number_percentiles=True) not implemented.
    return e


def date_embeddings(p, year, month, day, weekday, holidays):
    # sum of four embedding lookups + a linear on the multi-hot holiday vector
    e = (p['year'][year] + p['month'][month] + p['day'][day]
         + p['weekday'][weekday])
    e = e + jnp.matmul(holidays.astype(jnp.float32), p['hol_w']) + p['hol_b']
    return e


def init_params(key):
    ks = jax.random.split(key, 16)
    n = lambda k, shape, s=0.02: (s * jax.random.normal(k, shape)).astype(jnp.float32)
    return {
        'number': {
            'sign': n(ks[0], (N_SIGN, HIDDEN)),
            'exp': n(ks[1], (N_EXP, HIDDEN)),
            'frac': n(ks[2], (N_FRAC, HIDDEN)),
            'delta_w': n(ks[3], (HIDDEN,)),
            'delta_b': n(ks[4], (HIDDEN,)),
        },
        'date': {
            'year': n(ks[5], (N_YEAR, HIDDEN)),
            'month': n(ks[6], (N_MONTH, HIDDEN)),
            'day': n(ks[7], (N_DAY, HIDDEN)),
            'weekday': n(ks[8], (N_WEEKDAY, HIDDEN)),
            'hol_w': n(ks[9], (N_HOLIDAY, HIDDEN)),
            'hol_b': n(ks[10], (HIDDEN,)),
        },
        'col_w': n(ks[11], (EMB_DIM, HIDDEN)),
        'col_b': n(ks[12], (HIDDEN,)),
        'con_w': n(ks[13], (EMB_DIM, HIDDEN)),
        'con_b': n(ks[14], (HIDDEN,)),
        'ln_gamma': jnp.ones((HIDDEN,), jnp.float32),
        'ln_beta': jnp.zeros((HIDDEN,), jnp.float32),
    }


def one_token_embeddings_forward(params, input_dict, *, out_dtype=jnp.float32,
                                 tile_n=DEFAULT_TILE_N):
    B, S = input_dict['is_number'].shape
    n = B * S

    num_e = number_embeddings(params['number'],
                              input_dict['is_positive'],
                              input_dict['exponent'],
                              input_dict['fraction_bin'],
                              input_dict['delta'],
                              input_dict.get('percentile_values'))
    date_e = date_embeddings(params['date'],
                             input_dict['date_year'],
                             input_dict['date_month'],
                             input_dict['date_day'],
                             input_dict['date_weekday'],
                             input_dict['date_holidays'])

    is_number = input_dict['is_number']
    is_date = input_dict['is_date']
    is_text = jnp.logical_not(jnp.logical_or(is_number, is_date))

    # Fold the number/date gating into ONE [N, H] tensor in plain JAX: the
    # elementwise fuses with the upstream gathers and removes two [N, H]
    # streams + two [N, 1] masks from the kernel's HBM traffic.
    gated = (num_e * is_number[..., None].astype(num_e.dtype)
             + date_e * is_date[..., None].astype(date_e.dtype))
    gated = gated.reshape(n, HIDDEN).astype(jnp.float32)

    # Keep the sentence embeddings in their native dtype (no f32 upcast): the
    # kernel is HBM-BW bound and these are the dominant bytes/token.  When the
    # embeddings are bf16 the weights are cast down to match (MXU still
    # accumulates in f32) — small drift vs the f32 PyTorch reference.
    col = input_dict['column_embeddings'].reshape(n, EMB_DIM)
    con = input_dict['content_embeddings'].reshape(n, EMB_DIM)
    packed = jnp.concatenate([col, con], axis=-1)                 # [N, 2E]
    w_packed = jnp.concatenate([params['col_w'], params['con_w']],
                               axis=0).astype(packed.dtype)       # [2E, H]

    out = one_token_embeddings_fused(
        packed, w_packed, params['col_b'], params['con_b'],
        gated, is_text.reshape(n, 1).astype(jnp.float32),
        params['ln_gamma'], params['ln_beta'],
        eps=LN_EPS, tile_n=tile_n, out_dtype=out_dtype)
    # dropout is identity at inference time
    return out.reshape(B, S, HIDDEN)


# ------------------------- pure-JAX reference (check) ------------------------
def reference_forward(params, input_dict):
    num_e = number_embeddings(params['number'], input_dict['is_positive'],
                              input_dict['exponent'], input_dict['fraction_bin'],
                              input_dict['delta'])
    date_e = date_embeddings(params['date'], input_dict['date_year'],
                             input_dict['date_month'], input_dict['date_day'],
                             input_dict['date_weekday'], input_dict['date_holidays'])
    isnum = input_dict['is_number'][..., None].astype(jnp.float32)
    isdate = input_dict['is_date'][..., None].astype(jnp.float32)
    istext = jnp.logical_not(jnp.logical_or(
        input_dict['is_number'], input_dict['is_date']))[..., None].astype(jnp.float32)
    col = input_dict['column_embeddings'].astype(jnp.float32) @ params['col_w'] + params['col_b']
    con = input_dict['content_embeddings'].astype(jnp.float32) @ params['con_w'] + params['con_b']
    x = col + con * istext + num_e * isnum + date_e * isdate
    mean = x.mean(-1, keepdims=True)
    cx = x - mean
    var = (cx * cx).mean(-1, keepdims=True)
    y = cx * jax.lax.rsqrt(var + LN_EPS)
    return y * params['ln_gamma'] + params['ln_beta']


# ---------------------------------- main -------------------------------------
if __name__ == "__main__":
    B, S = 2, 8
    key = jax.random.PRNGKey(0)
    kp, *ki = jax.random.split(key, 14)
    params = init_params(kp)

    is_number = jax.random.bernoulli(ki[0], 0.4, (B, S))
    is_date = jnp.logical_and(jax.random.bernoulli(ki[1], 0.4, (B, S)),
                              jnp.logical_not(is_number))

    input_dict = {
        'is_positive': jax.random.randint(ki[2], (B, S), 0, N_SIGN),
        'exponent': jax.random.randint(ki[3], (B, S), 0, N_EXP),
        'fraction_bin': jax.random.randint(ki[4], (B, S), 0, N_FRAC),
        'delta': jax.random.normal(ki[5], (B, S), jnp.float32),
        'date_year': jax.random.randint(ki[6], (B, S), 0, N_YEAR),
        'date_month': jax.random.randint(ki[7], (B, S), 0, N_MONTH),
        'date_day': jax.random.randint(ki[8], (B, S), 0, N_DAY),
        'date_weekday': jax.random.randint(ki[9], (B, S), 0, N_WEEKDAY),
        'date_holidays': jax.random.bernoulli(ki[10], 0.1, (B, S, N_HOLIDAY)),
        'is_number': is_number,
        'is_date': is_date,
        'column_embeddings': jax.random.normal(ki[11], (B, S, EMB_DIM), jnp.float32),
        'content_embeddings': jax.random.normal(ki[12], (B, S, EMB_DIM), jnp.float32),
    }

    out = one_token_embeddings_forward(params, input_dict)
    jax.block_until_ready(out)
    assert out.shape == (B, S, HIDDEN) and out.dtype == jnp.float32

    ref = reference_forward(params, input_dict)
    np.testing.assert_allclose(np.asarray(out), np.asarray(ref),
                               atol=5e-2, rtol=5e-2)
    print("KERNEL_OK")
</pallas_src>

<mosaic_0001>
module attributes {stable_mosaic.version = 11 : i64} {
  func.func @_fused_kernel(%arg0: i32, %arg1: memref<16x128xf32, #tpu.memory_space<vmem>>, %arg2: memref<128x32xf32, #tpu.memory_space<vmem>>, %arg3: memref<1x32xf32, #tpu.memory_space<vmem>>, %arg4: memref<1x32xf32, #tpu.memory_space<vmem>>, %arg5: memref<16x32xf32, #tpu.memory_space<vmem>>, %arg6: memref<16x1xf32, #tpu.memory_space<vmem>>, %arg7: memref<1x32xf32, #tpu.memory_space<vmem>>, %arg8: memref<1x32xf32, #tpu.memory_space<vmem>>, %arg9: memref<16x32xf32, #tpu.memory_space<vmem>>) attributes {dimension_semantics = [#tpu.dimension_semantics<parallel>], iteration_bounds = array<i64: 1>, scalar_prefetch = 0 : i64, scratch_operands = 0 : i64, tpu.core_type = #tpu.core_type<tc>, window_params = [{transform_indices = @transform_0, window_bounds = array<i64: 16, 128>}, {pipeline_mode = #tpu.pipeline_mode<synchronous>, transform_indices = @transform_1, window_bounds = array<i64: 128, 32>}, {pipeline_mode = #tpu.pipeline_mode<synchronous>, transform_indices = @transform_2, window_bounds = array<i64: 1, 32>}, {pipeline_mode = #tpu.pipeline_mode<synchronous>, transform_indices = @transform_3, window_bounds = array<i64: 1, 32>}, {transform_indices = @transform_4, window_bounds = array<i64: 16, 32>}, {transform_indices = @transform_5, window_bounds = array<i64: 16, 1>}, {pipeline_mode = #tpu.pipeline_mode<synchronous>, transform_indices = @transform_6, window_bounds = array<i64: 1, 32>}, {pipeline_mode = #tpu.pipeline_mode<synchronous>, transform_indices = @transform_7, window_bounds = array<i64: 1, 32>}, {transform_indices = @transform_8, window_bounds = array<i64: 16, 32>}]} {
    %c0 = arith.constant 0 : index
    %c0_0 = arith.constant 0 : index
    %0 = vector.load %arg6[%c0, %c0_0] : memref<16x1xf32, #tpu.memory_space<vmem>>, vector<16x1xf32>
    %c0_1 = arith.constant 0 : index
    %c0_2 = arith.constant 0 : index
    %1 = vector.load %arg1[%c0_1, %c0_2] : memref<16x128xf32, #tpu.memory_space<vmem>>, vector<16x128xf32>
    %2 = tpu.iota {dimensions = array<i32: 1>} : vector<16x128xi32>
    %c64_i32 = arith.constant 64 : i32
    %3 = vector.broadcast %c64_i32 : i32 to vector<16x128xi32>
    %4 = arith.cmpi sge, %2, %3 : vector<16x128xi32>
    %cst = arith.constant 1.000000e+00 : f32
    %5 = vector.shape_cast %0 : vector<16x1xf32> to vector<16x1xf32>
    %6 = vector.broadcast %5 : vector<16x1xf32> to vector<16x128xf32>
    %7 = vector.broadcast %cst : f32 to vector<16x128xf32>
    %8 = arith.select %4, %6, %7 : vector<16x128xi1>, vector<16x128xf32>
    %9 = arith.mulf %1, %8 : vector<16x128xf32>
    %c0_3 = arith.constant 0 : index
    %c0_4 = arith.constant 0 : index
    %10 = vector.load %arg2[%c0_3, %c0_4] : memref<128x32xf32, #tpu.memory_space<vmem>>, vector<128x32xf32>
    %cst_5 = arith.constant dense<0.000000e+00> : vector<16x32xf32>
    %11 = tpu.matmul %9, %10, %cst_5 {dimension_numbers = #tpu.dot_dimension_numbers<[1], [0], [0], [1], [0, 0, 1, 1], [], []>} : vector<16x128xf32>, vector<128x32xf32>, vector<16x32xf32> -> vector<16x32xf32>
    %c0_6 = arith.constant 0 : index
    %c0_7 = arith.constant 0 : index
    %12 = vector.load %arg3[%c0_6, %c0_7] : memref<1x32xf32, #tpu.memory_space<vmem>>, vector<1x32xf32>
    %13 = vector.broadcast %12 : vector<1x32xf32> to vector<16x32xf32>
    %14 = arith.addf %11, %13 : vector<16x32xf32>
    %c0_8 = arith.constant 0 : index
    %c0_9 = arith.constant 0 : index
    %15 = vector.load %arg4[%c0_8, %c0_9] : memref<1x32xf32, #tpu.memory_space<vmem>>, vector<1x32xf32>
    %16 = vector.broadcast %15 : vector<1x32xf32> to vector<16x32xf32>
    %17 = vector.broadcast %0 : vector<16x1xf32> to vector<16x32xf32>
    %18 = arith.mulf %16, %17 : vector<16x32xf32>
    %19 = arith.addf %14, %18 : vector<16x32xf32>
    %c0_10 = arith.constant 0 : index
    %c0_11 = arith.constant 0 : index
    %20 = vector.load %arg5[%c0_10, %c0_11] : memref<16x32xf32, #tpu.memory_space<vmem>>, vector<16x32xf32>
    %21 = arith.addf %19, %20 : vector<16x32xf32>
    %cst_12 = arith.constant dense<0.000000e+00> : vector<16xf32>
    %22 = vector.multi_reduction <add>, %21, %cst_12 [1] : vector<16x32xf32> to vector<16xf32>
    %23 = vector.shape_cast %22 : vector<16xf32> to vector<16x1xf32>
    %cst_13 = arith.constant 3.200000e+01 : f32
    %24 = vector.broadcast %cst_13 : f32 to vector<16x1xf32>
    %25 = arith.divf %23, %24 : vector<16x1xf32>
    %26 = vector.broadcast %25 : vector<16x1xf32> to vector<16x32xf32>
    %27 = arith.subf %21, %26 : vector<16x32xf32>
    %28 = arith.mulf %27, %27 : vector<16x32xf32>
    %cst_14 = arith.constant dense<0.000000e+00> : vector<16xf32>
    %29 = vector.multi_reduction <add>, %28, %cst_14 [1] : vector<16x32xf32> to vector<16xf32>
    %30 = vector.shape_cast %29 : vector<16xf32> to vector<16x1xf32>
    %cst_15 = arith.constant 3.200000e+01 : f32
    %31 = vector.broadcast %cst_15 : f32 to vector<16x1xf32>
    %32 = arith.divf %30, %31 : vector<16x1xf32>
    %cst_16 = arith.constant 9.99999996E-13 : f32
    %33 = vector.broadcast %cst_16 : f32 to vector<16x1xf32>
    %34 = arith.addf %32, %33 : vector<16x1xf32>
    %35 = math.rsqrt %34 : vector<16x1xf32>
    %36 = vector.broadcast %35 : vector<16x1xf32> to vector<16x32xf32>
    %37 = arith.mulf %27, %36 : vector<16x32xf32>
    %c0_17 = arith.constant 0 : index
    %c0_18 = arith.constant 0 : index
    %38 = vector.load %arg7[%c0_17, %c0_18] : memref<1x32xf32, #tpu.memory_space<vmem>>, vector<1x32xf32>
    %39 = vector.broadcast %38 : vector<1x32xf32> to vector<16x32xf32>
    %40 = arith.mulf %37, %39 : vector<16x32xf32>
    %c0_19 = arith.constant 0 : index
    %c0_20 = arith.constant 0 : index
    %41 = vector.load %arg8[%c0_19, %c0_20] : memref<1x32xf32, #tpu.memory_space<vmem>>, vector<1x32xf32>
    %42 = vector.broadcast %41 : vector<1x32xf32> to vector<16x32xf32>
    %43 = arith.addf %40, %42 : vector<16x32xf32>
    %c0_21 = arith.constant 0 : index
    %c0_22 = arith.constant 0 : index
    %44 = vector.load %arg9[%c0_21, %c0_22] : memref<16x32xf32, #tpu.memory_space<vmem>>, vector<16x32xf32>
    tpu.vector_store %arg9[%c0_21, %c0_22], %43 {strides = array<i32>} : memref<16x32xf32, #tpu.memory_space<vmem>>, vector<16x32xf32>,
    return
  }
  func.func @transform_0(%arg0: i32) -> (i32, i32) {
    %c0_i32 = arith.constant 0 : i32
    %c0_i32_0 = arith.constant 0 : i32
    return %arg0, %c0_i32 : i32, i32
  }
  func.func @transform_1(%arg0: i32) -> (i32, i32) {
    %c0_i32 = arith.constant 0 : i32
    %c0_i32_0 = arith.constant 0 : i32
    %c0_i32_1 = arith.constant 0 : i32
    return %c0_i32, %c0_i32_0 : i32, i32
  }
  func.func @transform_2(%arg0: i32) -> (i32, i32) {
    %c0_i32 = arith.constant 0 : i32
    %c0_i32_0 = arith.constant 0 : i32
    %c0_i32_1 = arith.constant 0 : i32
    return %c0_i32, %c0_i32_0 : i32, i32
  }
  func.func @transform_3(%arg0: i32) -> (i32, i32) {
    %c0_i32 = arith.constant 0 : i32
    %c0_i32_0 = arith.constant 0 : i32
    %c0_i32_1 = arith.constant 0 : i32
    return %c0_i32, %c0_i32_0 : i32, i32
  }
  func.func @transform_4(%arg0: i32) -> (i32, i32) {
    %c0_i32 = arith.constant 0 : i32
    %c0_i32_0 = arith.constant 0 : i32
    return %arg0, %c0_i32 : i32, i32
  }
  func.func @transform_5(%arg0: i32) -> (i32, i32) {
    %c0_i32 = arith.constant 0 : i32
    %c0_i32_0 = arith.constant 0 : i32
    return %arg0, %c0_i32 : i32, i32
  }
  func.func @transform_6(%arg0: i32) -> (i32, i32) {
    %c0_i32 = arith.constant 0 : i32
    %c0_i32_0 = arith.constant 0 : i32
    %c0_i32_1 = arith.constant 0 : i32
    return %c0_i32, %c0_i32_0 : i32, i32
  }
  func.func @transform_7(%arg0: i32) -> (i32, i32) {
    %c0_i32 = arith.constant 0 : i32
    %c0_i32_0 = arith.constant 0 : i32
    %c0_i32_1 = arith.constant 0 : i32
    return %c0_i32, %c0_i32_0 : i32, i32
  }
  func.func @transform_8(%arg0: i32) -> (i32, i32) {
    %c0_i32 = arith.constant 0 : i32
    %c0_i32_0 = arith.constant 0 : i32
    return %arg0, %c0_i32 : i32, i32
  }
}

</mosaic_0001>

<bundles_post_ra>
// kernel: tpu_custom_call.1
= control target key start
LH: loop header
LB: loop body
LE: loop exit
PB: predicated region body
PF: predicated region fallthrough
CT: control target
= control target key end

     0   :  { %v248_v2 = vmov 0   ;;  %s385_s0 = inlined_call_operand.vmem [shape: f32[16,128], index: 0, kind: input, shape index: {}]   ;;  %s386_s1 = inlined_call_operand.vmem [shape: f32[128,32], index: 1, kind: input, shape index: {}]   ;;  %s387_s2 = inlined_call_operand.vmem [shape: f32[1,32], index: 2, kind: input, shape index: {}]   ;;  %s388_s3 = inlined_call_operand.vmem [shape: f32[1,32], index: 3, kind: input, shape index: {}]   ;;  %s389_s4 = inlined_call_operand.vmem [shape: f32[16,32], index: 4, kind: input, shape index: {}]   ;;  %s390_s5 = inlined_call_operand.vmem [shape: f32[16,1], index: 5, kind: input, shape index: {}]   ;;  %s391_s6 = inlined_call_operand.vmem [shape: f32[1,32], index: 6, kind: input, shape index: {}]   ;;  %s392_s7 = inlined_call_operand.vmem [shape: f32[1,32], index: 7, kind: input, shape index: {}]   ;;  %s393_s8 = inlined_call_operand.hbm [shape: f32[16,32], index: 8, kind: output, shape index: {}]  }
   0x1   :  { %v30_v0 = vld [vmem:[%s390_s5] sm:$0xff]  ;;  %v66_v1 = vld [vmem:[%s386_s1 + $0x78] sm:$0xff]  ;;  %211 = vset.pattern.permute.xlu0 %v248_v2  ;;  %v65_v3 = vld [vmem:[%s386_s1 + $0x70] sm:$0xff] }
   0x2   :  { %71 = vmatpush.msra.mxu0 %v66_v1  ;;  %39 = vperm.xlu0 %211, %v30_v0   ;;  %v64_v4 = vld [vmem:[%s386_s1 + $0x68] sm:$0xff]  ;;  %v63_v5 = vld [vmem:[%s386_s1 + $0x60] sm:$0xff]  ;;  %v62_v6 = vld [vmem:[%s386_s1 + $0x58] sm:$0xff] }
   0x3   :  { %190 = vmatpush.msra.mxu1 %v66_v1 }
   0x4   :  { %72 = vmatpush.msra.mxu0 %v65_v3 }
   0x5   :  { %191 = vmatpush.msra.mxu1 %v65_v3 }
   0x6   :  { %73 = vmatpush.msra.mxu0 %v64_v4 }
   0x7   :  { %192 = vmatpush.msra.mxu1 %v64_v4 }
   0x8   :  { %13 = vsyncpa [#allocation3], 0  ;;  %v31_v7 = vld [vmem:[%s390_s5 + $0x8] sm:$0xff]  ;;  %74 = vmatpush.msra.mxu0 %v63_v5  ;;  %v61_v8 = vld [vmem:[%s386_s1 + $0x50] sm:$0xff]  ;;  %v34_v19 = vlaneseq  ;;  %vm106_vm1 = vcmask 261120   ;;  %v249_v45 = vmov 32.0  }
   0x9   :  { %193 = vmatpush.msra.mxu1 %v63_v5  ;;  %v60_v9 = vld [vmem:[%s386_s1 + $0x48] sm:$0xff]  ;;  %v59_v10 = vld [vmem:[%s386_s1 + $0x40] sm:$0xff]  ;;  %v58_v11 = vld [vmem:[%s386_s1 + $0x38] sm:$0xff]  ;;  %216 = vrcp.f32 %v249_v45  ;;  %s178_s9 = sshll.u32 %s393_s8, 4  ;;  %s252_s10 = smov 8   ;;  %s179_s9 = int_to_ptr.hbm [resolvable:$true] %s178_s9 }
   0xa   :  { %75 = vmatpush.msra.mxu0 %v62_v6  ;;  %44 = vperm.xlu0 %211, %v31_v7   ;;  %v57_v12 = vld [vmem:[%s386_s1 + $0x30] sm:$0xff]  ;;  %v56_v13 = vld [vmem:[%s386_s1 + $0x28] sm:$0xff]  ;;  %v55_v14 = vld [vmem:[%s386_s1 + $0x20] sm:$0xff]  ;;  %v35_v20 = vand.u32 127, %v34_v19 }
   0xb   :  { %194 = vmatpush.msra.mxu1 %v62_v6  ;;  %v54_v15 = vld [vmem:[%s386_s1 + $0x18] sm:$0xff]  ;;  %v53_v16 = vld [vmem:[%s386_s1 + $0x10] sm:$0xff]  ;;  %v52_v17 = vld [vmem:[%s386_s1 + $0x8] sm:$0xff] }
   0xc   :  { %76 = vmatpush.msra.mxu0 %v61_v8  ;;  %v51_v18 = vld [vmem:[%s386_s1] sm:$0xff]  ;;  %vm36_vm0 = vcmp.ge.s32.totalorder %v35_v20, 64  ;;  %v33_v25 = vld [vmem:[%s385_s0 + $0x8] sm:$0xff] }
   0xd   :  { %195 = vmatpush.msra.mxu1 %v61_v8  ;;  %v32_v21 = vld [vmem:[%s385_s0] sm:$0xff]  ;;  %v103_v41 = vld [vmem:[%s389_s4 + $0x8] sm:$0xff] }
   0xe   :  { %77 = vmatpush.msra.mxu0 %v60_v9  ;;  %v212_v29 = vld [vmem:[%s388_s3] ss:$0 sm:$0xff] }
   0xf   :  { %196 = vmatpush.msra.mxu1 %v60_v9  ;;  %v213_v30 = vld [vmem:[%s387_s2] ss:$0 sm:$0xff]  ;;  %v217_v46 = vpop.eup %216 }
  0x10   :  { %78 = vmatpush.msra.mxu0 %v59_v10  ;;  %v102_v34 = vld [vmem:[%s389_s4] sm:$0xff]  ;;  %v114_v47 = vmul.f32 32.0, %v217_v46  ;;  %vm118_vm2 = vweird.f32 %v217_v46 }
  0x11   :  { %197 = vmatpush.msra.mxu1 %v59_v10 }
  0x12   :  { %79 = vmatpush.msra.mxu0 %v58_v11  ;;  %v115_v48 = vsub.f32 1.0, %v114_v47 }
  0x13   :  { %198 = vmatpush.msra.mxu1 %v58_v11 }
  0x14   :  { %80 = vmatpush.msra.mxu0 %v57_v12  ;;  %v116_v49 = vmul.f32 %v217_v46, %v115_v48 }
  0x15   :  { %199 = vmatpush.msra.mxu1 %v57_v12  ;;  %v214_v12 = vld [vmem:[%s391_s6] ss:$0 sm:$0xff]  ;;  %s250_s6 = smov [#allocation2]  }
  0x16   :  { %81 = vmatpush.msra.mxu0 %v56_v13  ;;  %v117_v50 = vadd.f32 %v217_v46, %v116_v49  ;;  %s176_s28 = sshll.u32 %s250_s6, 4  ;;  %s177_s28 = int_to_ptr.vmem [resolvable:$true] %s176_s28 }
  0x17   :  { %200 = vmatpush.msra.mxu1 %v56_v13 }
  0x18   :  { %82 = vmatpush.msra.mxu0 %v55_v14  ;;  %v119_v51 = vsel %vm118_vm2, %v217_v46, %v117_v50 }
  0x19   :  { %201 = vmatpush.msra.mxu1 %v55_v14 }
  0x1a   :  { %83 = vmatpush.msra.mxu0 %v54_v15 }
  0x1b   :  { %202 = vmatpush.msra.mxu1 %v54_v15 }
  0x1c   :  { %84 = vmatpush.msra.mxu0 %v53_v16 }
  0x1d   :  { %203 = vmatpush.msra.mxu1 %v53_v16  ;;  %v215_v16 = vld [vmem:[%s392_s7] ss:$0 sm:$0xff]  ;;  %s251_s7 = smov 128  }
  0x1e   :  { %85 = vmatpush.msra.mxu0 %v52_v17 }
  0x1f   :  { %204 = vmatpush.msra.mxu1 %v52_v17 }
  0x20   :  { %86 = vmatpush.msra.mxu0 %v51_v18 }
  0x21   :  { %205 = vmatpush.msra.mxu1 %v51_v18 }
  0x74   :  { %v40_v22 = vpop.permute.xlu0 %39 }
  0x75   :  { %v47_v23 = vsel %vm36_vm0, %v40_v22, 1.0  ;;  %v98_v32 = vmul.f32 %v212_v29, %v40_v22 }
  0x76   :  { %v49_v24 = vmul.f32 %v47_v23, %v32_v21 }
  0x78   :  { %87 = vmatmul.f32.vlgmr.msra.gmra.mxu0 %v49_v24 }
  0x7c   :  { %v45_v26 = vpop.permute.xlu0 %44 }
  0x7d   :  { %v48_v27 = vsel %vm36_vm0, %v45_v26, 1.0  ;;  %v99_v39 = vmul.f32 %v212_v29, %v45_v26 }
  0x7e   :  { %v50_v28 = vmul.f32 %v48_v27, %v33_v25 }
  0x80   :  { %90 = vmatmul.f32.vlgmr.msra.gmra.mxu1 %v50_v28 }
  0xf5   :  { %v88_v31 = vpop.f32.mrf.mxu0 }
  0xf6   :  { %v89_v33 = vadd.f32 %v213_v30, %v88_v31 }
  0xf8   :  { %v100_v35 = vadd.f32 %v98_v32, %v89_v33 }
  0xfa   :  { %v104_v36 = vadd.f32 %v102_v34, %v100_v35 }
  0xfc   :  { %v107_v37 = vsel %vm106_vm1, %v104_v36, 0.0 }
  0xfd   :  { %108 = vadd.xlane.f32.xlu1 %v107_v37  ;;  %v91_v38 = vpop.f32.mrf.mxu1 }
  0xfe   :  { %v92_v40 = vadd.f32 %v213_v30, %v91_v38 }
 0x100   :  { %v101_v42 = vadd.f32 %v99_v39, %v92_v40 }
 0x102   :  { %v105_v43 = vadd.f32 %v103_v41, %v101_v42 }
 0x104   :  { %v110_v44 = vsel %vm106_vm1, %v105_v43, 0.0 }
 0x105   :  { %111 = vadd.xlane.f32.xlu1 %v110_v44 }
 0x170   :  { %v109_v52 = vpop.xlane.xlu1 %108 }
 0x171   :  { %v120_v53 = vmul.f32 %v119_v51, %v109_v52 }
 0x173   :  { %v122_v54 = vsub.f32 %v104_v36, %v120_v53 }
 0x175   :  { %v124_v55 = vmul.f32 %v122_v54, %v122_v54 }
 0x177   :  { %v126_v56 = vsel %vm106_vm1, %v124_v55, 0.0 }
 0x178   :  { %127 = vadd.xlane.f32.xlu2 %v126_v56  ;;  %v112_v57 = vpop.xlane.xlu1 %111 }
 0x179   :  { %v121_v58 = vmul.f32 %v119_v51, %v112_v57 }
 0x17b   :  { %v123_v59 = vsub.f32 %v105_v43, %v121_v58 }
 0x17d   :  { %v125_v60 = vmul.f32 %v123_v59, %v123_v59 }
 0x17f   :  { %v129_v61 = vsel %vm106_vm1, %v125_v60, 0.0 }
 0x180   :  { %130 = vadd.xlane.f32.xlu2 %v129_v61 }
 0x1eb   :  { %v128_v62 = vpop.xlane.xlu2 %127 }
 0x1ec   :  { %v132_v63 = vmul.f32 %v128_v62, %v119_v51 }
 0x1ee   :  { %v134_v0 = vadd.f32 1e-12, %v132_v63 }
 0x1f0   :  { %218 = vrsqrt.f32 %v134_v0  ;;  %vm142_vm4 = vweird.f32 %v134_v0 }
 0x1f3   :  { %v131_v1 = vpop.xlane.xlu2 %130 }
 0x1f4   :  { %v133_v2 = vmul.f32 %v131_v1, %v119_v51 }
 0x1f6   :  { %v219_v3 = vpop.eup %218  ;;  %v135_v4 = vadd.f32 1e-12, %v133_v2 }
 0x1f7   :  { %v137_v5 = vmul.f32 %v219_v3, %v134_v0  ;;  %vm143_vm3 = vweird.f32 %v219_v3 }
 0x1f8   :  { %220 = vrsqrt.f32 %v135_v4  ;;  %vm144_vm5 = vmor %vm142_vm4, %vm143_vm3  ;;  %vm152_vm7 = vweird.f32 %v135_v4 }
 0x1f9   :  { %v138_v6 = vmul.f32 %v219_v3, %v137_v5 }
 0x1fb   :  { %v139_v7 = vmul.f32 0.5, %v138_v6 }
 0x1fd   :  { %v140_v8 = vsub.f32 1.5, %v139_v7 }
 0x1fe   :  { %v221_v9 = vpop.eup %220 }
 0x1ff   :  { %v141_v10 = vmul.f32 %v219_v3, %v140_v8  ;;  %v147_v11 = vmul.f32 %v221_v9, %v135_v4  ;;  %vm153_vm6 = vweird.f32 %v221_v9 }
 0x200   :  { %vm154_vm8 = vmor %vm152_vm7, %vm153_vm6 }
 0x201   :  { %v145_v13 = vsel %vm144_vm5, %v219_v3, %v141_v10  ;;  %v148_v14 = vmul.f32 %v221_v9, %v147_v11 }
 0x202   :  { %v156_v15 = vmul.f32 %v145_v13, %v122_v54 }
 0x203   :  { %v149_v17 = vmul.f32 0.5, %v148_v14 }
 0x204   :  { %v162_v18 = vmul.f32 %v214_v12, %v156_v15 }
 0x205   :  { %v150_v19 = vsub.f32 1.5, %v149_v17 }
 0x206   :  { %v168_v20 = vadd.f32 %v215_v16, %v162_v18 }
 0x207   :  { %v151_v21 = vmul.f32 %v221_v9, %v150_v19 }
 0x208   :  { %170 = vst.msk [vmem:[#allocation2] sm:$0xff] %vm106_vm1, %v168_v20 }
 0x209   :  { %v155_v22 = vsel %vm154_vm8, %v221_v9, %v151_v21 }
 0x20a   :  { %v157_v23 = vmul.f32 %v155_v22, %v123_v59 }
 0x20c   :  { %v163_v24 = vmul.f32 %v214_v12, %v157_v23 }
 0x20e   :  { %v169_v25 = vadd.f32 %v215_v16, %v163_v24 }
 0x210   :  { %171 = vst.msk [vmem:[#allocation2 + $0x8] sm:$0xff] %vm106_vm1, %v169_v25 }
 0x211   :  { %184 = dma.vmem_to_hbm [thread:$0]  %s177_s28, 256, %s179_s9, [#allocation3], %s251_s7, %s251_s7, %s252_s10  }
 0x212   :  { %246 = dma.done.wait [#allocation3], 256  }
 0x213   :  { %247 = vsyncadd [#allocation3], 4294967040 }
 0x214   :  { %189 = vsyncpa [#allocation3], 1 }

</bundles_post_ra>
